<compile_context>
chip_gen: v7x
topology: tpu7x:2x2x1
jax: 0.10.0
libtpu: 0.0.40
codegen_flags: <defaults>
</compile_context>

<pallas_src>
import jax
import jax.numpy as jnp
from jax.experimental import pallas as pl
from jax.experimental.pallas import tpu as pltpu


def _round_up(a, b):
    return (a + b - 1) // b * b


def _cdiv(a, b):
    return (a + b - 1) // b


# --------------------------------------------------------------------------
# Kernel 1: pre-project the node feature table against all embedders at once.
#   P[n, :] = feats[n, :] @ W_all + b_all          (N_pad, E*H)
# --------------------------------------------------------------------------
def _project_kernel(feats_ref, w_ref, b_ref, p_ref):
    acc = jnp.dot(feats_ref[...], w_ref[...],
                  preferred_element_type=jnp.float32)      # (tn, E*H) f32
    p_ref[...] = (acc + b_ref[...]).astype(p_ref.dtype)


# --------------------------------------------------------------------------
# Kernel 2: per-row-tile gather of the pre-projected table.
#   out[r, :] = P[idx[r], :]      (exact row selection via onehot @ P on MXU)
# --------------------------------------------------------------------------
def _gather_kernel(idx_ref, p_ref, o_ref):
    tm = idx_ref.shape[0]
    n = p_ref.shape[0]
    idx = idx_ref[...]                                          # (tm, 1) int32
    iota = jax.lax.broadcasted_iota(jnp.int32, (tm, n), 1)      # (tm, N)
    onehot = (iota == idx).astype(p_ref.dtype)                  # no f32 temp
    o_ref[...] = jnp.dot(onehot, p_ref[...],
                         preferred_element_type=jnp.float32).astype(o_ref.dtype)


def multi_embedder_aggregate(node_seq, node_feats, weights, biases, *,
                             compute_dtype=jnp.bfloat16,
                             out_dtype=jnp.bfloat16,
                             tm_target=1024):
    """Fused MultiEmbedderAggregator forward.

    node_seq:   (B, S) int32 node indices
    node_feats: (N, D) float32 node feature table (the relevant part of G)
    weights:    (E, D, H) float32 per-embedder projection weights
    biases:     (E, H)    float32 per-embedder biases
    returns:    (B, S, E*H) out_dtype == concat_e(feats[node_seq] @ W_e + b_e, -1)
    """
    B, S = node_seq.shape
    N, D = node_feats.shape
    E, D2, H = weights.shape
    assert D == D2, (D, D2)
    M = B * S
    EH = E * H

    cd_bytes = jnp.dtype(compute_dtype).itemsize
    out_bytes = jnp.dtype(out_dtype).itemsize

    # Fold all embedders into one wide projection (columns e*H:(e+1)*H == W_e).
    w_all = jnp.transpose(weights, (1, 0, 2)).reshape(D, EH).astype(compute_dtype)
    b_all = biases.reshape(1, EH).astype(jnp.float32)

    # Pad the node dimension so projection tiles satisfy the (8, 128) rule.
    tn = min(512, _round_up(N, 8))
    N_pad = _round_up(N, tn)
    feats = node_feats.astype(compute_dtype)
    if N_pad != N:
        feats = jnp.pad(feats, ((0, N_pad - N), (0, 0)))   # padded rows never gathered

    # ---- Pass 1: P = feats @ W_all + b_all, independent of M ----
    p_cost = pl.CostEstimate(
        flops=2 * N_pad * D * EH,
        transcendentals=0,
        bytes_accessed=(N_pad * D * cd_bytes + D * EH * cd_bytes + EH * 4
                        + N_pad * EH * cd_bytes),
    )
    p_table = pl.pallas_call(
        _project_kernel,
        out_shape=jax.ShapeDtypeStruct((N_pad, EH), compute_dtype),
        grid=(N_pad // tn,),
        in_specs=[
            pl.BlockSpec((tn, D), lambda i: (i, 0)),     # feature rows for tile i
            pl.BlockSpec((D, EH), lambda i: (0, 0)),     # fused weights
            pl.BlockSpec((1, EH), lambda i: (0, 0)),     # fused biases
        ],
        out_specs=pl.BlockSpec((tn, EH), lambda i: (i, 0)),
        compiler_params=pltpu.CompilerParams(
            dimension_semantics=("parallel",),
            vmem_limit_bytes=48 * 1024 * 1024,
        ),
        cost_estimate=p_cost,
    )(feats, w_all, b_all)

    # ---- Pass 2: gather rows of P by node id, tiled over M ----
    # >= 2 balanced tiles (when M allows) so both v7x TCs get work, and tm is
    # derived from ceil-div so the last tile carries minimal padding.
    num_tiles = max(2, _cdiv(M, tm_target))
    tm = _round_up(_cdiv(M, num_tiles), 8)
    M_pad = _round_up(M, tm)

    idx = node_seq.reshape(-1).astype(jnp.int32)
    if M_pad != M:
        idx = jnp.pad(idx, (0, M_pad - M))   # padded rows gather node 0; sliced off below
    idx2d = idx.reshape(M_pad, 1)

    g_cost = pl.CostEstimate(
        flops=2 * M_pad * N_pad * EH,
        transcendentals=0,
        bytes_accessed=(M_pad * 4 + N_pad * EH * cd_bytes + M_pad * EH * out_bytes),
    )
    out = pl.pallas_call(
        _gather_kernel,
        out_shape=jax.ShapeDtypeStruct((M_pad, EH), out_dtype),
        grid=(M_pad // tm,),
        in_specs=[
            pl.BlockSpec((tm, 1), lambda i: (i, 0)),       # node ids for tile i
            pl.BlockSpec((N_pad, EH), lambda i: (0, 0)),   # projected table (VMEM resident)
        ],
        out_specs=pl.BlockSpec((tm, EH), lambda i: (i, 0)),
        compiler_params=pltpu.CompilerParams(
            dimension_semantics=("parallel",),             # shard tiles over TCs
            vmem_limit_bytes=48 * 1024 * 1024,
        ),
        cost_estimate=g_cost,
    )(idx2d, p_table)

    return out[:M].reshape(B, S, EH)


def reference(node_seq, node_feats, weights, biases):
    x = node_feats[node_seq]  # (B, S, D)
    outs = [x @ weights[e] + biases[e] for e in range(weights.shape[0])]
    return jnp.concatenate(outs, axis=-1)


if __name__ == "__main__":
    # Small, deterministic problem.
    B, S = 2, 8        # batch, sequence length of node ids
    N, D = 64, 32      # number of nodes in G, node feature dim
    E, H = 3, 128      # number of embedders, per-embedder hidden dim

    key = jax.random.PRNGKey(0)
    k_seq, k_feat, k_w, k_b = jax.random.split(key, 4)

    node_seq = jax.random.randint(k_seq, (B, S), 0, N, dtype=jnp.int32)
    node_feats = jax.random.normal(k_feat, (N, D), dtype=jnp.float32)
    weights = jax.random.normal(k_w, (E, D, H), dtype=jnp.float32) * 0.05
    biases = jax.random.normal(k_b, (E, H), dtype=jnp.float32) * 0.01

    ref = reference(node_seq, node_feats, weights, biases)

    # Exactness check with f32 compute + f32 output.
    out_f32 = multi_embedder_aggregate(node_seq, node_feats, weights, biases,
                                       compute_dtype=jnp.float32,
                                       out_dtype=jnp.float32)
    out_f32 = jax.block_until_ready(out_f32)
    assert out_f32.shape == (B, S, E * H), out_f32.shape
    assert jnp.allclose(out_f32, ref, atol=1e-3, rtol=1e-3), "fp32 mismatch"

    # Default perf path: bf16 table + bf16 output (f32 accumulation on MXU).
    out_bf16 = multi_embedder_aggregate(node_seq, node_feats, weights, biases)
    out_bf16 = jax.block_until_ready(out_bf16)
    assert out_bf16.shape == (B, S, E * H), out_bf16.shape
    assert out_bf16.dtype == jnp.bfloat16, out_bf16.dtype
    assert jnp.allclose(out_bf16.astype(jnp.float32), ref,
                        atol=5e-2, rtol=5e-2), "bf16 mismatch"

    print("KERNEL_OK")
</pallas_src>

<mosaic_0001>
module attributes {stable_mosaic.version = 11 : i64} {
  func.func @_project_kernel(%arg0: i32, %arg1: memref<64x32xf32, #tpu.memory_space<vmem>>, %arg2: memref<32x384xf32, #tpu.memory_space<vmem>>, %arg3: memref<1x384xf32, #tpu.memory_space<vmem>>, %arg4: memref<64x384xf32, #tpu.memory_space<vmem>>) attributes {dimension_semantics = [#tpu.dimension_semantics<parallel>], iteration_bounds = array<i64: 1>, scalar_prefetch = 0 : i64, scratch_operands = 0 : i64, tpu.core_type = #tpu.core_type<tc>, window_params = [{transform_indices = @transform_0, window_bounds = array<i64: 64, 32>}, {pipeline_mode = #tpu.pipeline_mode<synchronous>, transform_indices = @transform_1, window_bounds = array<i64: 32, 384>}, {pipeline_mode = #tpu.pipeline_mode<synchronous>, transform_indices = @transform_2, window_bounds = array<i64: 1, 384>}, {transform_indices = @transform_3, window_bounds = array<i64: 64, 384>}]} {
    %c0 = arith.constant 0 : index
    %c0_0 = arith.constant 0 : index
    %0 = vector.load %arg1[%c0, %c0_0] : memref<64x32xf32, #tpu.memory_space<vmem>>, vector<64x32xf32>
    %c0_1 = arith.constant 0 : index
    %c0_2 = arith.constant 0 : index
    %1 = vector.load %arg2[%c0_1, %c0_2] : memref<32x384xf32, #tpu.memory_space<vmem>>, vector<32x384xf32>
    %cst = arith.constant dense<0.000000e+00> : vector<64x384xf32>
    %2 = tpu.matmul %0, %1, %cst {dimension_numbers = #tpu.dot_dimension_numbers<[1], [0], [0], [1], [0, 0, 1, 1], [], []>} : vector<64x32xf32>, vector<32x384xf32>, vector<64x384xf32> -> vector<64x384xf32>
    %c0_3 = arith.constant 0 : index
    %c0_4 = arith.constant 0 : index
    %3 = vector.load %arg3[%c0_3, %c0_4] : memref<1x384xf32, #tpu.memory_space<vmem>>, vector<1x384xf32>
    %4 = vector.broadcast %3 : vector<1x384xf32> to vector<64x384xf32>
    %5 = arith.addf %2, %4 : vector<64x384xf32>
    %c0_5 = arith.constant 0 : index
    %c0_6 = arith.constant 0 : index
    %6 = vector.load %arg4[%c0_5, %c0_6] : memref<64x384xf32, #tpu.memory_space<vmem>>, vector<64x384xf32>
    tpu.vector_store %arg4[%c0_5, %c0_6], %5 {strides = array<i32>} : memref<64x384xf32, #tpu.memory_space<vmem>>, vector<64x384xf32>,
    return
  }
  func.func @transform_0(%arg0: i32) -> (i32, i32) {
    %c0_i32 = arith.constant 0 : i32
    %c0_i32_0 = arith.constant 0 : i32
    return %arg0, %c0_i32 : i32, i32
  }
  func.func @transform_1(%arg0: i32) -> (i32, i32) {
    %c0_i32 = arith.constant 0 : i32
    %c0_i32_0 = arith.constant 0 : i32
    %c0_i32_1 = arith.constant 0 : i32
    return %c0_i32, %c0_i32_0 : i32, i32
  }
  func.func @transform_2(%arg0: i32) -> (i32, i32) {
    %c0_i32 = arith.constant 0 : i32
    %c0_i32_0 = arith.constant 0 : i32
    %c0_i32_1 = arith.constant 0 : i32
    return %c0_i32, %c0_i32_0 : i32, i32
  }
  func.func @transform_3(%arg0: i32) -> (i32, i32) {
    %c0_i32 = arith.constant 0 : i32
    %c0_i32_0 = arith.constant 0 : i32
    return %arg0, %c0_i32 : i32, i32
  }
}

</mosaic_0001>

<bundles_post_ra>
// kernel: tpu_custom_call.1
= control target key start
LH: loop header
LB: loop body
LE: loop exit
PB: predicated region body
PF: predicated region fallthrough
CT: control target
= control target key end

     0   :  { %v431_v7 = vmov 0.0   ;;  %s566_s0 = inlined_call_operand.vmem [shape: f32[64,32], index: 0, kind: input, shape index: {}]   ;;  %s567_s1 = inlined_call_operand.vmem [shape: f32[32,384], index: 1, kind: input, shape index: {}]   ;;  %s568_s2 = inlined_call_operand.vmem [shape: f32[1,384], index: 2, kind: input, shape index: {}]   ;;  %s569_s3 = inlined_call_operand.hbm [shape: f32[64,384], index: 3, kind: output, shape index: {}]  }
   0x1   :  { %v24_v0 = vld [vmem:[%s567_s1 + $0x8] sm:$0xff]  ;;  %v27_v1 = vld [vmem:[%s567_s1 + $0x20] sm:$0xff]  ;;  %v26_v4 = vld [vmem:[%s567_s1 + $0x18] sm:$0xff]  ;;  %141 = vmatprep.mubr.f32.mxu0 %v431_v7  ;;  %177 = vmatprep.mubr.f32.mxu1 %v431_v7 }
   0x2   :  { %v23_v2 = vld [vmem:[%s567_s1] sm:$0xff]  ;;  %v383_v3 = vpack.c.bf16 %v27_v1, %v24_v0  ;;  %v30_v5 = vld [vmem:[%s567_s1 + $0x38] sm:$0xff]  ;;  %v33_v6 = vld [vmem:[%s567_s1 + $0x50] sm:$0xff] }
   0x3   :  { %v385_v8 = vpack.c.bf16 %v26_v4, %v23_v2  ;;  %v387_v9 = vpack.c.bf16 %v33_v6, %v30_v5  ;;  %v29_v10 = vld [vmem:[%s567_s1 + $0x30] sm:$0xff]  ;;  %v32_v11 = vld [vmem:[%s567_s1 + $0x48] sm:$0xff]  ;;  %v31_v16 = vld [vmem:[%s567_s1 + $0x40] sm:$0xff] }
   0x4   :  { %384 = vmatprep.subr.bf16.mxu0 %v383_v3  ;;  %399 = vmatprep.subr.bf16.mxu1 %v383_v3  ;;  %v25_v12 = vld [vmem:[%s567_s1 + $0x10] sm:$0xff]  ;;  %v28_v13 = vld [vmem:[%s567_s1 + $0x28] sm:$0xff]  ;;  %v389_v14 = vpack.c.bf16 %v32_v11, %v29_v10  ;;  %v34_v17 = vld [vmem:[%s567_s1 + $0x58] sm:$0xff] }
   0x5   :  { %386 = vmatpush1.bf16.msra.mxu0 %v385_v8  ;;  %401 = vmatpush1.bf16.msra.mxu1 %v385_v8  ;;  %v391_v15 = vpack.c.bf16 %v28_v13, %v25_v12 }
   0x6   :  { %388 = vmatprep.subr.bf16.mxu0 %v387_v9  ;;  %400 = vmatprep.subr.bf16.mxu1 %v387_v9 }
   0x7   :  { %8 = vsyncpa [#allocation3], 0  ;;  %v15_v18 = vld [vmem:[%s566_s0] sm:$0xff]  ;;  %vm52_vm0 = vcmask 261120   ;;  %v21_v19 = vld [vmem:[%s566_s0 + $0x30] sm:$0xff]  ;;  %v395_v20 = vpack.c.bf16 %v34_v17, %v31_v16  ;;  %v37_v27 = vlaneseq }
   0x8   :  { %v16_v21 = vld [vmem:[%s566_s0 + $0x8] sm:$0xff]  ;;  %v22_v22 = vld [vmem:[%s566_s0 + $0x38] sm:$0xff]  ;;  %v17_v23 = vld [vmem:[%s566_s0 + $0x10] sm:$0xff] }
   0x9   :  { %390 = vmatpush1.bf16.msra.mxu0 %v389_v14  ;;  %402 = vmatpush1.bf16.msra.mxu1 %v389_v14  ;;  %v18_v24 = vld [vmem:[%s566_s0 + $0x18] sm:$0xff]  ;;  %v19_v25 = vld [vmem:[%s566_s0 + $0x20] sm:$0xff]  ;;  %v20_v26 = vld [vmem:[%s566_s0 + $0x28] sm:$0xff]  ;;  %v38_v28 = vshrl.u32 %v37_v27, 7  ;;  %s432_s0 = smov [#allocation2]  }
   0xa   :  { %392 = vmatprep.subr.bf16.mxu1 %v391_v15  ;;  %v35_v30 = vld [vmem:[%s568_s2] sm:$0x7]  ;;  %s324_s2 = sshll.u32 %s432_s0, 4  ;;  %s325_s2 = int_to_ptr.vmem [resolvable:$true] %s324_s2 }
   0xb   :  { %v39_v29 = vsub.s32 0, %v38_v28  ;;  %v43_v31 = vsub.s32 1, %v38_v28  ;;  %v47_v40 = vsub.s32 2, %v38_v28  ;;  %s407_s26 = scalar_lea.vmem %s325_s2, 3072  ;;  %p412_p1 = scmp.lt.s32.totalorder %s325_s2, %s325_s2 }
   0xc   :  { %335 = vmatmul.mubr.msk.f32.vlgmr.msra.gmra.mrb[0].mxu0 %vm52_vm0, %v15_v18  ;;  %341 = vmatmul.mubr.msk.f32.vlgmr.msra.gmra.mrb[0].mxu1 %vm52_vm0, %v21_v19  ;;  %p408_p0 = scmp.ne.s32.totalorder %s325_s2, %s407_s26  ;;  %p413_p2 = scmp.lt.s32.totalorder %s407_s26, %s407_s26 }
   0xd   :  { %394 = vmatpush3.bf16.msra.mxu1 %v391_v15  ;;  %147 = vmatprep.mubr.f32.mxu0 %v431_v7  ;;  %v534_v32 = vrot.slane %v35_v30, %v39_v29  ;;  %v536_v33 = vrot.slane %v35_v30, %v43_v31  ;;  %v48_v49 = vrot.slane %v35_v30, %v47_v40 }
   0xe   :  { %183 = vmatprep.mubr.f32.mxu1 %v431_v7  ;;  %396 = vmatprep.subr.bf16.mxu1 %v395_v20  ;;  %p414_p3 = por %p413_p2, %p412_p1 }
  0x10   :  { %336 = vmatmul.mubr.msk.f32.gmra.mrb[2].mxu0 %vm52_vm0, %v16_v21  ;;  %342 = vmatmul.mubr.msk.f32.gmra.mrb[2].mxu1 %vm52_vm0, %v22_v22  ;;  %p415_p4 = pnand %p414_p3, %p408_p0 }
  0x11   :  { %398 = vmatpush3.bf16.msra.mxu1 %v395_v20  ;;  %153 = vmatprep.mubr.f32.mxu0 %v431_v7 }
  0x12   :  { %371 = vmatprep.mubr.msk.f32.mxu1 %vm52_vm0, %v15_v18 }
  0x14   :  { %337 = vmatmul.mubr.msk.f32.gmra.mrb[4].mxu0 %vm52_vm0, %v17_v23  ;;  %372 = vmatmul.mubr.msk.f32.vlgmr.msra.gmra.mrb[4].mxu1 %vm52_vm0, %v16_v21 }
  0x15   :  { %159 = vmatprep.mubr.f32.mxu0 %v431_v7  ;;  %374 = vmatprep.mubr.msk.f32.mxu1 %vm52_vm0, %v17_v23 }
  0x18   :  { %338 = vmatmul.mubr.msk.f32.gmra.mrb[6].mxu0 %vm52_vm0, %v18_v24  ;;  %375 = vmatmul.mubr.msk.f32.gmra.mrb[6].mxu1 %vm52_vm0, %v18_v24 }
  0x19   :  { %165 = vmatprep.mubr.f32.mxu0 %v431_v7  ;;  %377 = vmatprep.mubr.msk.f32.mxu1 %vm52_vm0, %v19_v25 }
  0x1c   :  { %339 = vmatmul.mubr.msk.f32.gmra.mrb[8].mxu0 %vm52_vm0, %v19_v25  ;;  %378 = vmatmul.mubr.msk.f32.gmra.mrb[8].mxu1 %vm52_vm0, %v20_v26 }
  0x1d   :  { %171 = vmatprep.mubr.f32.mxu0 %v431_v7  ;;  %380 = vmatprep.mubr.msk.f32.mxu1 %vm52_vm0, %v21_v19 }
  0x20   :  { %340 = vmatmul.mubr.msk.f32.gmra.mrb[10].mxu0 %vm52_vm0, %v20_v26  ;;  %381 = vmatmul.mubr.msk.f32.gmra.mrb[10].mxu1 %vm52_vm0, %v22_v22 }
  0xdf   :  { %v143_v34 = vpop.f32.mrb[0].mxu0  ;;  %v179_v35 = vpop.f32.mrb[0].mxu1 }
  0xe0   :  { %v144_v36 = vadd.f32 %v143_v34, %v534_v32  ;;  %v180_v37 = vadd.f32 %v179_v35, %v534_v32  ;;  %v145_v38 = vpop.f32.mrb[1].mxu0  ;;  %v181_v39 = vpop.f32.mrb[1].mxu1 }
  0xe1   :  { %v146_v41 = vadd.f32 %v145_v38, %v536_v33  ;;  %v182_v42 = vadd.f32 %v181_v39, %v536_v33 }
  0xe2   :  { %295 = vst [vmem:[#allocation2] sm:$0xff] %v144_v36  ;;  %313 = vst [vmem:[#allocation2 + $0x90] sm:$0xff] %v180_v37 }
  0xe3   :  { %296 = vst [vmem:[#allocation2 + $0x8] sm:$0xff] %v146_v41  ;;  %314 = vst [vmem:[#allocation2 + $0x98] sm:$0xff] %v182_v42  ;;  %v149_v43 = vpop.f32.mrb[2].mxu0  ;;  %v185_v44 = vpop.f32.mrb[2].mxu1 }
  0xe4   :  { %v150_v45 = vadd.f32 %v149_v43, %v534_v32  ;;  %v186_v46 = vadd.f32 %v185_v44, %v534_v32  ;;  %v151_v47 = vpop.f32.mrb[3].mxu0  ;;  %v187_v48 = vpop.f32.mrb[3].mxu1 }
  0xe5   :  { %v152_v50 = vadd.f32 %v151_v47, %v536_v33  ;;  %v188_v51 = vadd.f32 %v187_v48, %v536_v33 }
  0xe6   :  { %298 = vst [vmem:[#allocation2 + $0x18] sm:$0xff] %v150_v45  ;;  %316 = vst [vmem:[#allocation2 + $0xa8] sm:$0xff] %v186_v46 }
  0xe7   :  { %299 = vst [vmem:[#allocation2 + $0x20] sm:$0xff] %v152_v50  ;;  %317 = vst [vmem:[#allocation2 + $0xb0] sm:$0xff] %v188_v51  ;;  %v155_v52 = vpop.f32.mrb[4].mxu0  ;;  %v373_v53 = vpop.f32.mrb[4].mxu1 }
  0xe8   :  { %v156_v54 = vadd.f32 %v155_v52, %v534_v32  ;;  %v262_v55 = vadd.f32 %v373_v53, %v48_v49  ;;  %v157_v56 = vpop.f32.mrb[5].mxu0  ;;  %v256_v57 = vpop.f32.mrb[5].mxu1 }
  0xe9   :  { %v158_v58 = vadd.f32 %v157_v56, %v536_v33  ;;  %v257_v59 = vadd.f32 %v256_v57, %v48_v49 }
  0xea   :  { %301 = vst [vmem:[#allocation2 + $0x30] sm:$0xff] %v156_v54  ;;  %300 = vst [vmem:[#allocation2 + $0x28] sm:$0xff] %v262_v55 }
  0xeb   :  { %302 = vst [vmem:[#allocation2 + $0x38] sm:$0xff] %v158_v58  ;;  %297 = vst [vmem:[#allocation2 + $0x10] sm:$0xff] %v257_v59  ;;  %v161_v60 = vpop.f32.mrb[6].mxu0  ;;  %v376_v61 = vpop.f32.mrb[6].mxu1 }
  0xec   :  { %v162_v62 = vadd.f32 %v161_v60, %v534_v32  ;;  %v272_v63 = vadd.f32 %v376_v61, %v48_v49  ;;  %v163_v0 = vpop.f32.mrb[7].mxu0  ;;  %v266_v1 = vpop.f32.mrb[7].mxu1 }
  0xed   :  { %v164_v2 = vadd.f32 %v163_v0, %v536_v33  ;;  %v267_v3 = vadd.f32 %v266_v1, %v48_v49 }
  0xee   :  { %304 = vst [vmem:[#allocation2 + $0x48] sm:$0xff] %v162_v62  ;;  %306 = vst [vmem:[#allocation2 + $0x58] sm:$0xff] %v272_v63 }
  0xef   :  { %305 = vst [vmem:[#allocation2 + $0x50] sm:$0xff] %v164_v2  ;;  %303 = vst [vmem:[#allocation2 + $0x40] sm:$0xff] %v267_v3  ;;  %v167_v4 = vpop.f32.mrb[8].mxu0  ;;  %v379_v5 = vpop.f32.mrb[8].mxu1 }
  0xf0   :  { %v168_v6 = vadd.f32 %v167_v4, %v534_v32  ;;  %v282_v7 = vadd.f32 %v379_v5, %v48_v49  ;;  %v169_v8 = vpop.f32.mrb[9].mxu0  ;;  %v276_v9 = vpop.f32.mrb[9].mxu1 }
  0xf1   :  { %v170_v10 = vadd.f32 %v169_v8, %v536_v33  ;;  %v277_v11 = vadd.f32 %v276_v9, %v48_v49 }
  0xf2   :  { %307 = vst [vmem:[#allocation2 + $0x60] sm:$0xff] %v168_v6  ;;  %312 = vst [vmem:[#allocation2 + $0x88] sm:$0xff] %v282_v7 }
  0xf3   :  { %308 = vst [vmem:[#allocation2 + $0x68] sm:$0xff] %v170_v10  ;;  %309 = vst [vmem:[#allocation2 + $0x70] sm:$0xff] %v277_v11  ;;  %v173_v12 = vpop.f32.mrb[10].mxu0  ;;  %v382_v13 = vpop.f32.mrb[10].mxu1 }
  0xf4   :  { %v174_v14 = vadd.f32 %v173_v12, %v534_v32  ;;  %v292_v15 = vadd.f32 %v382_v13, %v48_v49  ;;  %v175_v16 = vpop.f32.mrb[11].mxu0  ;;  %v286_v17 = vpop.f32.mrb[11].mxu1 }
  0xf5   :  { %v176_v18 = vadd.f32 %v175_v16, %v536_v33  ;;  %v287_v19 = vadd.f32 %v286_v17, %v48_v49 }
  0xf6   :  { %310 = vst [vmem:[#allocation2 + $0x78] sm:$0xff] %v174_v14  ;;  %318 = vst [vmem:[#allocation2 + $0xb8] sm:$0xff] %v292_v15 }
  0xf7   :  { %311 = vst [vmem:[#allocation2 + $0x80] sm:$0xff] %v176_v18  ;;  %315 = vst [vmem:[#allocation2 + $0xa0] sm:$0xff] %v287_v19 }
  0xf8   :  { %418 = shalt.err (!%p415_p4)
}
  0xf9   :  { %s419_s29 = scalar_lea.hbm %s569_s3, 3072 }
  0xfa   :  { %p420_p5 = scmp.ne.s32.totalorder %s569_s3, %s419_s29  ;;  %p423_p6 = scmp.lt.u32.totalorder %s419_s29, %s569_s3 }
  0xfc   :  { %p425_p7 = pnand %p423_p6, %p420_p5 }
  0xfe   :  { %428 = shalt.err (!%p425_p7)
}
  0xff   :  { %s433_s7 = smov 384   ;;  %s434_s8 = smov 24  }
 0x100   :  { %330 = dma.vmem_to_hbm [thread:$0]  %s325_s2, 3072, %s569_s3, [#allocation3], %s433_s7, %s433_s7, %s434_s8  }
 0x101   :  { %429 = dma.done.wait [#allocation3], 3072  }
 0x102   :  { %430 = vsyncadd [#allocation3], 4294964224 }
 0x103   :  { %334 = vsyncpa [#allocation3], 1 }

</bundles_post_ra>
